<compile_context>
chip_gen: v5e
topology: v5e:2x2
jax: 0.10.0
libtpu: 0.0.40
codegen_flags: <defaults>
</compile_context>

<pallas_src>
import functools

import jax
import jax.numpy as jnp
from jax.experimental import pallas as pl
from jax.experimental.pallas import tpu as pltpu


def _round_up(x, m):
    return ((x + m - 1) // m) * m


def _largest_divisor(n, cap, quantum):
    """Largest d with d | n, d <= cap and d % quantum == 0 (None if none)."""
    cap = min(n, cap)
    best = None
    for d in range(quantum, cap + 1, quantum):
        if n % d == 0:
            best = d
    return best


def mean_pool_kernel(h_ref, m_ref, o_ref, acc_ref, den_ref, *, sub):
    # h_ref:   (TB, TS, H)  hidden tile (input dtype)
    # m_ref:   (TB, TS, 1)  mask tile (32-bit), broadcasts along H (lanes)
    # o_ref:   (TB, 1, H)   output block, resident across the S grid axis
    # acc_ref: (TB, 1, H)   f32 running masked sum   (VMEM scratch)
    # den_ref: (TB, 1, 1)   f32 running mask count   (VMEM scratch)
    s = pl.program_id(1)
    ts = h_ref.shape[1]

    @pl.when(s == 0)
    def _init():
        acc_ref[...] = jnp.zeros_like(acc_ref)
        den_ref[...] = jnp.zeros_like(den_ref)

    def accumulate(h, m):
        acc_ref[...] += jnp.sum(h * m, axis=1, keepdims=True)   # (TB, 1, H)
        den_ref[...] += jnp.sum(m, axis=1, keepdims=True)       # (TB, 1, 1)

    if sub >= ts:
        # Small tile: single pass, no chunking needed.
        accumulate(h_ref[...].astype(jnp.float32), m_ref[...].astype(jnp.float32))
    else:
        # Chunk the tile along S so f32 intermediates stay near vreg scale.
        @pl.loop(0, ts // sub)
        def _chunk(i):
            start = pl.multiple_of(i * sub, sub)
            h = h_ref[:, pl.ds(start, sub), :].astype(jnp.float32)
            m = m_ref[:, pl.ds(start, sub), :].astype(jnp.float32)
            accumulate(h, m)

    @pl.when(s == pl.num_programs(1) - 1)
    def _finalize():
        den = jnp.maximum(den_ref[...], 1e-9)                    # torch.clamp(min=1e-9)
        o_ref[...] = (acc_ref[...] / den).astype(o_ref.dtype)


def mean_pooling(hidden_state, attention_mask, *, batch_tile=None, seq_tile=None,
                 sub_rows=None, vmem_limit_bytes=None):
    """hidden_state: [B, S, H], attention_mask: [B, S] -> [B, H] masked mean over S.

    batch_tile / seq_tile / sub_rows act as caps; actual tiles are the largest
    divisors of B / S / TS not exceeding them (so nothing is ever padded).
    """
    B, S, H = hidden_state.shape
    out_dtype = hidden_state.dtype
    bpe = jnp.dtype(out_dtype).itemsize
    quantum = {4: 8, 2: 16, 1: 32}.get(bpe, 8)     # sublane rows per vreg tile

    # --- generation-aware VMEM budget ---------------------------------------
    if vmem_limit_bytes is None:
        try:
            vmem_cap = pltpu.get_tpu_info().vmem_capacity_bytes
        except Exception:
            vmem_cap = 128 * 1024 * 1024
        # ~48 MiB on 128-MiB v5e/v6e, ~24 MiB on 64-MiB/TC v7x.
        vmem_limit_bytes = max(8 << 20, min(48 << 20, (vmem_cap * 3) // 8))
    input_budget = min(8 << 20, vmem_limit_bytes // 2)   # double-buffered input tiles

    H_lanes = _round_up(H, 128)
    row_bytes = H_lanes * bpe + 128 * 4   # hidden row + lane-padded 32-bit mask row

    # --- batch tile: divisor of B, keep >= 2 parallel grid steps when possible
    tb_cap = batch_tile if batch_tile is not None else 8
    tb_cap = max(1, min(tb_cap, B, max(1, B // 2)))
    TB = _largest_divisor(B, tb_cap, 1) or 1

    # --- sequence tile: divisor of S, multiple of the sublane quantum --------
    max_ts = max(quantum, input_budget // (2 * TB * row_bytes))
    if seq_tile is not None:
        max_ts = min(max_ts, max(quantum, seq_tile))
    if S <= max_ts:
        TS = S
    else:
        TS = _largest_divisor(S, max_ts, quantum)
        if TS is None:
            # Pathological S (no quantum-aligned divisor): never pad the full
            # (B, S, H) tensor; take the whole row and let the in-kernel chunk
            # loop bound the working set.
            TS = S
            TB = 1

    # --- inner chunk rows: divisor of TS, ~<= 1 MiB f32 intermediates --------
    sub_cap = max(quantum, (1 << 20) // (TB * H_lanes * 4))
    if sub_rows is not None:
        sub_cap = max(quantum, min(sub_cap, sub_rows))
    if TS <= sub_cap:
        SUB = TS
    else:
        SUB = _largest_divisor(TS, sub_cap, quantum) or TS

    # --- mask: keep 32-bit dtypes native in HBM, widen narrower ones ---------
    m = attention_mask.reshape(B, S, 1)
    if jnp.dtype(m.dtype).itemsize != 4:
        m = m.astype(jnp.float32)

    grid = (B // TB, S // TS)

    out = pl.pallas_call(
        functools.partial(mean_pool_kernel, sub=SUB),
        out_shape=jax.ShapeDtypeStruct((B, 1, H), out_dtype),
        grid_spec=pltpu.PrefetchScalarGridSpec(
            num_scalar_prefetch=0,
            grid=grid,
            in_specs=[
                pl.BlockSpec((TB, TS, H), lambda b, s: (b, s, 0)),
                pl.BlockSpec((TB, TS, 1), lambda b, s: (b, s, 0)),
            ],
            # same block for every s -> output stays resident (accumulator pattern)
            out_specs=pl.BlockSpec((TB, 1, H), lambda b, s: (b, 0, 0)),
            scratch_shapes=[
                pltpu.VMEM((TB, 1, H), jnp.float32),   # masked-sum accumulator
                pltpu.VMEM((TB, 1, 1), jnp.float32),   # mask-count accumulator
            ],
        ),
        compiler_params=pltpu.CompilerParams(
            dimension_semantics=("parallel", "arbitrary"),
            vmem_limit_bytes=vmem_limit_bytes,
        ),
    )(hidden_state, m)
    return out.reshape(B, H)


def mean_pooling_ref(hidden_state, attention_mask):
    # Pure-JAX reference mirroring the PyTorch forward (f32 accumulation).
    m = attention_mask[..., None].astype(jnp.float32)
    num = jnp.sum(hidden_state.astype(jnp.float32) * m, axis=1)
    den = jnp.maximum(jnp.sum(m, axis=1), 1e-9)
    return (num / den).astype(hidden_state.dtype)


if __name__ == "__main__":
    key = jax.random.PRNGKey(0)
    k1, k2, k3, k4, k5, k6 = jax.random.split(key, 6)

    # Case 1: small shape implied by the module (single reduction step).
    B, S, H = 2, 8, 32
    hidden = jax.random.normal(k1, (B, S, H), dtype=jnp.float32)
    mask = (jax.random.uniform(k2, (B, S)) > 0.3).astype(jnp.float32)
    out = jax.block_until_ready(mean_pooling(hidden, mask))
    ref = mean_pooling_ref(hidden, mask)
    assert out.shape == (B, H)
    assert jnp.allclose(out, ref, atol=1e-5, rtol=1e-5)

    # Case 2: S-tiled reduction with divisor tiles (no padded hidden copy),
    # native int32 mask kept in HBM and cast inside the kernel.
    B2, S2, H2 = 3, 200, 128
    hidden2 = jax.random.normal(k3, (B2, S2, H2), dtype=jnp.float32)
    mask2 = (jax.random.uniform(k4, (B2, S2)) > 0.3).astype(jnp.int32)
    out2 = jax.block_until_ready(
        mean_pooling(hidden2, mask2, batch_tile=2, seq_tile=128))
    ref2 = mean_pooling_ref(hidden2, mask2)
    assert out2.shape == (B2, H2)
    assert jnp.allclose(out2, ref2, atol=1e-5, rtol=1e-5)

    # Case 3: bf16 hidden + inner chunk loop (SUB < TS) path.
    B3, S3, H3 = 2, 64, 128
    hidden3 = jax.random.normal(k5, (B3, S3, H3), dtype=jnp.bfloat16)
    mask3 = (jax.random.uniform(k6, (B3, S3)) > 0.3).astype(jnp.float32)
    out3 = jax.block_until_ready(
        mean_pooling(hidden3, mask3, seq_tile=32, sub_rows=16))
    ref3 = mean_pooling_ref(hidden3, mask3)
    assert out3.shape == (B3, H3)
    assert jnp.allclose(out3.astype(jnp.float32), ref3.astype(jnp.float32),
                        atol=2e-2, rtol=2e-2)

    print("KERNEL_OK")
</pallas_src>

<mosaic_0001>
module attributes {stable_mosaic.version = 11 : i64} {
  func.func @mean_pool_kernel(%arg0: i32, %arg1: i32, %arg2: memref<1x8x32xf32, #tpu.memory_space<vmem>>, %arg3: memref<1x8x1xf32, #tpu.memory_space<vmem>>, %arg4: memref<1x1x32xf32, #tpu.memory_space<vmem>>, %arg5: memref<1x1x32xf32, #tpu.memory_space<vmem>>, %arg6: memref<1x1x1xf32, #tpu.memory_space<vmem>>) attributes {dimension_semantics = [#tpu.dimension_semantics<parallel>, #tpu.dimension_semantics<arbitrary>], iteration_bounds = array<i64: 2, 1>, scalar_prefetch = 0 : i64, scratch_operands = 2 : i64, tpu.core_type = #tpu.core_type<tc>, window_params = [{transform_indices = @transform_0, window_bounds = array<i64: 1, 8, 32>}, {transform_indices = @transform_1, window_bounds = array<i64: 1, 8, 1>}, {transform_indices = @transform_2, window_bounds = array<i64: 1, 1, 32>}]} {
    %c0_i32 = arith.constant 0 : i32
    %0 = arith.cmpi eq, %arg1, %c0_i32 : i32
    %1 = arith.extui %0 : i1 to i32
    %c0_i32_0 = arith.constant 0 : i32
    %2 = arith.cmpi ne, %1, %c0_i32_0 : i32
    scf.if %2 {
      %cst_21 = arith.constant 0.000000e+00 : f32
      %20 = vector.broadcast %cst_21 : f32 to vector<1x1x32xf32>
      %c0_22 = arith.constant 0 : index
      %c0_23 = arith.constant 0 : index
      %c0_24 = arith.constant 0 : index
      %21 = vector.load %arg5[%c0_22, %c0_23, %c0_24] : memref<1x1x32xf32, #tpu.memory_space<vmem>>, vector<1x1x32xf32>
      tpu.vector_store %arg5[%c0_22, %c0_23, %c0_24], %20 {strides = array<i32>} : memref<1x1x32xf32, #tpu.memory_space<vmem>>, vector<1x1x32xf32>,
      %cst_25 = arith.constant 0.000000e+00 : f32
      %22 = vector.broadcast %cst_25 : f32 to vector<1x1x1xf32>
      %c0_26 = arith.constant 0 : index
      %c0_27 = arith.constant 0 : index
      %c0_28 = arith.constant 0 : index
      %23 = vector.load %arg6[%c0_26, %c0_27, %c0_28] : memref<1x1x1xf32, #tpu.memory_space<vmem>>, vector<1x1x1xf32>
      tpu.vector_store %arg6[%c0_26, %c0_27, %c0_28], %22 {strides = array<i32>} : memref<1x1x1xf32, #tpu.memory_space<vmem>>, vector<1x1x1xf32>,
    } else {
    }
    %c0 = arith.constant 0 : index
    %c0_1 = arith.constant 0 : index
    %c0_2 = arith.constant 0 : index
    %3 = vector.load %arg2[%c0, %c0_1, %c0_2] : memref<1x8x32xf32, #tpu.memory_space<vmem>>, vector<1x8x32xf32>
    %c0_3 = arith.constant 0 : index
    %c0_4 = arith.constant 0 : index
    %c0_5 = arith.constant 0 : index
    %4 = vector.load %arg3[%c0_3, %c0_4, %c0_5] : memref<1x8x1xf32, #tpu.memory_space<vmem>>, vector<1x8x1xf32>
    %c0_6 = arith.constant 0 : index
    %c0_7 = arith.constant 0 : index
    %c0_8 = arith.constant 0 : index
    %5 = vector.load %arg5[%c0_6, %c0_7, %c0_8] : memref<1x1x32xf32, #tpu.memory_space<vmem>>, vector<1x1x32xf32>
    %6 = vector.broadcast %4 : vector<1x8x1xf32> to vector<1x8x32xf32>
    %7 = arith.mulf %3, %6 : vector<1x8x32xf32>
    %cst = arith.constant dense<0.000000e+00> : vector<1x32xf32>
    %8 = vector.multi_reduction <add>, %7, %cst [1] : vector<1x8x32xf32> to vector<1x32xf32>
    %9 = vector.shape_cast %8 : vector<1x32xf32> to vector<1x1x32xf32>
    %10 = arith.addf %5, %9 : vector<1x1x32xf32>
    %c0_9 = arith.constant 0 : index
    %c0_10 = arith.constant 0 : index
    %c0_11 = arith.constant 0 : index
    %11 = vector.load %arg5[%c0_9, %c0_10, %c0_11] : memref<1x1x32xf32, #tpu.memory_space<vmem>>, vector<1x1x32xf32>
    tpu.vector_store %arg5[%c0_9, %c0_10, %c0_11], %10 {strides = array<i32>} : memref<1x1x32xf32, #tpu.memory_space<vmem>>, vector<1x1x32xf32>,
    %c0_12 = arith.constant 0 : index
    %c0_13 = arith.constant 0 : index
    %c0_14 = arith.constant 0 : index
    %12 = vector.load %arg6[%c0_12, %c0_13, %c0_14] : memref<1x1x1xf32, #tpu.memory_space<vmem>>, vector<1x1x1xf32>
    %cst_15 = arith.constant dense<0.000000e+00> : vector<1x1xf32>
    %13 = vector.multi_reduction <add>, %4, %cst_15 [1] : vector<1x8x1xf32> to vector<1x1xf32>
    %14 = vector.shape_cast %13 : vector<1x1xf32> to vector<1x1x1xf32>
    %15 = arith.addf %12, %14 : vector<1x1x1xf32>
    %c0_16 = arith.constant 0 : index
    %c0_17 = arith.constant 0 : index
    %c0_18 = arith.constant 0 : index
    %16 = vector.load %arg6[%c0_16, %c0_17, %c0_18] : memref<1x1x1xf32, #tpu.memory_space<vmem>>, vector<1x1x1xf32>
    tpu.vector_store %arg6[%c0_16, %c0_17, %c0_18], %15 {strides = array<i32>} : memref<1x1x1xf32, #tpu.memory_space<vmem>>, vector<1x1x1xf32>,
    %c0_i32_19 = arith.constant 0 : i32
    %17 = arith.cmpi eq, %arg1, %c0_i32_19 : i32
    %18 = arith.extui %17 : i1 to i32
    %c0_i32_20 = arith.constant 0 : i32
    %19 = arith.cmpi ne, %18, %c0_i32_20 : i32
    scf.if %19 {
      %c0_21 = arith.constant 0 : index
      %c0_22 = arith.constant 0 : index
      %c0_23 = arith.constant 0 : index
      %20 = vector.load %arg6[%c0_21, %c0_22, %c0_23] : memref<1x1x1xf32, #tpu.memory_space<vmem>>, vector<1x1x1xf32>
      %cst_24 = arith.constant 9.99999971E-10 : f32
      %21 = vector.broadcast %cst_24 : f32 to vector<1x1x1xf32>
      %22 = arith.maximumf %20, %21 : vector<1x1x1xf32>
      %c0_25 = arith.constant 0 : index
      %c0_26 = arith.constant 0 : index
      %c0_27 = arith.constant 0 : index
      %23 = vector.load %arg5[%c0_25, %c0_26, %c0_27] : memref<1x1x32xf32, #tpu.memory_space<vmem>>, vector<1x1x32xf32>
      %24 = vector.broadcast %22 : vector<1x1x1xf32> to vector<1x1x32xf32>
      %25 = arith.divf %23, %24 : vector<1x1x32xf32>
      %c0_28 = arith.constant 0 : index
      %c0_29 = arith.constant 0 : index
      %c0_30 = arith.constant 0 : index
      %26 = vector.load %arg4[%c0_28, %c0_29, %c0_30] : memref<1x1x32xf32, #tpu.memory_space<vmem>>, vector<1x1x32xf32>
      tpu.vector_store %arg4[%c0_28, %c0_29, %c0_30], %25 {strides = array<i32>} : memref<1x1x32xf32, #tpu.memory_space<vmem>>, vector<1x1x32xf32>,
    } else {
    }
    return
  }
  func.func @transform_0(%arg0: i32, %arg1: i32) -> (i32, i32, i32) {
    %c0_i32 = arith.constant 0 : i32
    %c0_i32_0 = arith.constant 0 : i32
    return %arg0, %arg1, %c0_i32 : i32, i32, i32
  }
  func.func @transform_1(%arg0: i32, %arg1: i32) -> (i32, i32, i32) {
    %c0_i32 = arith.constant 0 : i32
    %c0_i32_0 = arith.constant 0 : i32
    return %arg0, %arg1, %c0_i32 : i32, i32, i32
  }
  func.func @transform_2(%arg0: i32, %arg1: i32) -> (i32, i32, i32) {
    %c0_i32 = arith.constant 0 : i32
    %c0_i32_0 = arith.constant 0 : i32
    %c0_i32_1 = arith.constant 0 : i32
    return %arg0, %c0_i32, %c0_i32_0 : i32, i32, i32
  }
}

</mosaic_0001>

<bundles_post_ra>
// kernel: tpu_custom_call.1
= control target key start
LH: loop header
LB: loop body
LE: loop exit
PB: predicated region body
PF: predicated region fallthrough
CT: control target
= control target key end

     0   :  { %7 = vsyncpa [#allocation5], 0  ;;  %s622_s0 = inlined_call_operand.vmem [shape: f32[2,8,32], index: 0, kind: input, shape index: {}]   ;;  %s623_s1 = inlined_call_operand.vmem [shape: f32[2,8,1], index: 1, kind: input, shape index: {}]   ;;  %s624_s2 = inlined_call_operand.hbm [shape: f32[2,1,32], index: 2, kind: output, shape index: {}]  }
   0x1   :  { %9 = vsyncpa [#allocation5 + $0x1], 0  ;;  %s517_s9 = smov 0   ;;  %s519_s10 = smov 0  }
   0x2   :  { %s521_s11 = smov 0   ;;  %s523_s12 = smov 0  }
   0x3   :  { %s525_s13 = smov 0   ;;  %s527_s14 = smov 0  }
   0x4 LB: > { %s351_s15 = sadd.s32 4294967295, %s498_s14   ;;  %s352_s16 = sadd.s32 4294967294, %s498_s14   ;;  %s498_s14 = sphi %s527_s14, %s15_s14   ;;  %s494_s13 = sphi %s525_s13, %s631_s13   ;;  %s490_s12 = sphi %s523_s12, %s630_s12   ;;  %s486_s11 = sphi %s521_s11, %s629_s11   ;;  %s482_s10 = sphi %s519_s10, %s628_s10   ;;  %s478_s9 = sphi %s517_s9, %s627_s9  }
   0x5   : > { %s27_s17 = sadd.s32 1, %s494_s13  ;;  %s90_s18 = sadd.s32 1, %s486_s11 }
   0x6   : > { %p29_p0 = scmp.ge.s32.totalorder %s27_s17, 2  ;;  %p100_p1 = scmp.ne.s32.totalorder %s486_s11, %s482_s10 }
   0x7   : > { %p101_p2 = scmp.eq.s32.totalorder %s351_s15, 1  ;;  %p106_p3 = scmp.ne.s32.totalorder %s482_s10, %s478_s9 }
   0x8   : > { %s633_s17 = smov (%p29_p0, %s27_s17), 0  ;;  %p107_p5 = scmp.eq.s32.totalorder %s352_s16, 1 }
   0x9   : > { %p557_p4 = por %p101_p2, %p100_p1  ;;  %s87_s20 = ssub.s32 %s494_s13, %s633_s17 }
   0xa   : > { %p355_p6 = scmp.ge.s32.totalorder %s498_s14, 1  ;;  %p88_p7 = scmp.eq.s32.totalorder %s87_s20, 0 }
   0xb   : > { %p564_p8 = por %p107_p5, %p106_p3  ;;  %p145_p9 = scmp.lt.s32.totalorder %s498_s14, 3 }
   0xc   : > { %s570_s22 = scalar_select %p88_p7, %s486_s11, %s90_s18  }
   0xd   : > { %p146_p10 = pnand %p355_p6, %p145_p9 }
   0xe   : > { %p175_p11 = scmp.lt.s32.totalorder (!%p146_p10), %s490_s12, 1  ;;  %s173_s3 = sand.u32 (!%p146_p10), 1, %s482_s10  }
   0xf   : > { %149 = sbr.rel (%p146_p10) target bundleno = 189 (0xbd), region = 28  ;;  %s266_s6 = scalar_lea.hbm (!%p146_p10), %s624_s2, %s490_s12 }
  0x10   : > { %s174_s7 = scalar_lea.vmem (!%p146_p10), [#allocation4], %s173_s3  ;;  %s270_s15 = sshll.u32 (!%p146_p10), %s266_s6, 4  ;;  %s271_s15 = int_to_ptr.hbm [resolvable:$true] %s270_s15 }
  0x11   : > { %s268_s8 = sshll.u32 (!%p146_p10), %s174_s7, 4  ;;  %s258_s16 = scalar_lea.sflag (!%p146_p10), [#allocation5], %s173_s3  ;;  %s269_s8 = int_to_ptr.vmem [resolvable:$true] %s268_s8 }
  0x12   : > { %s434_s18 = sshra.s32 (!%p146_p10), %s271_s15, 4  ;;  %s435_s18 = int_to_ptr.hbm [resolvable:$true] %s434_s18 }
  0x13   : > { %p441_p1 = scmp.lt.s32.totalorder (!%p146_p10), %s435_s18, %s624_s2 }
  0x14   : > { %vm195_vm0 = vcmask 0   ;;  %v500_v0 = vmov 0   ;;  %v501_v1 = vmov 0.0   ;;  %s176_s23 = scalar_select %p175_p11, %s490_s12, 1  ;;  %vm218_vm1 = vcmask 7168  }
  0x15   : > { %417 = vset.pattern.permute.xlu0 %v500_v0  ;;  %196 = vst.msk [vmem:[#allocation3] sm:$0x1] %vm195_vm0, %v501_v1  ;;  %vm193_vm2 = vcmask 253952   ;;  %vm206_vm3 = vcmask 261120   ;;  %s436_s12 = scalar_lea.hbm %s435_s18, 1 }
  0x16   : > { %s356_s24 = sshll.u32 %s176_s23, 3  ;;  %194 = vst.msk [vmem:[#allocation2] sm:$0x1] %vm193_vm2, %v501_v1  ;;  %p437_p12 = scmp.ne.s32.totalorder %s435_s18, %s436_s12 }
  0x17   : > { %s188_s27 = scalar_lea.vmem %s623_s1, %s356_s24  ;;  %s181_s30 = scalar_lea.vmem %s622_s0, %s356_s24 }
  0x18   : > { %v198_v2 = vld [vmem:[%s188_s27] sm:$0xff]  ;;  %p438_p13 = pnand %p437_p12, %p557_p4  ;;  %s440_s24 = scalar_lea.hbm %s624_s2, 2 }
  0x19   : > { %202 = vperm.xlu0 %417, %v198_v2   ;;  %v219_v3 = vsel %vm218_vm1, %v198_v2, 0.0  ;;  %v197_v14 = vld [vmem:[%s181_s30] sm:$0xff]  ;;  %p442_p2 = scmp.lt.s32.totalorder %s440_s24, %s436_s12 }
  0x1a   : > { %v220_v4 = vrot.slane %v219_v3, 4  ;;  %p439_p0 = pneg %p438_p13 }
  0x1b   : > { %p443_p3 = por %p442_p2, %p441_p1 }
  0x1c   : > { %v221_v5 = vadd.f32 %v220_v4, %v219_v3  ;;  %v217_v9 = vld [vmem:[#allocation3] sm:$0x1] }
  0x1d   : > { %v199_v23 = vld [vmem:[#allocation2] sm:$0x1]  ;;  %p444_p5 = pnand %p443_p3, %p439_p0 }
  0x1e   : > { %v222_v6 = vrot.slane %v221_v5, 2 }
  0x20   : > { %v223_v7 = vadd.f32 %v222_v6, %v221_v5 }
  0x22   : > { %v224_v8 = vrot.slane %v223_v7, 1 }
  0x24   : > { %v225_v10 = vadd.f32 %v224_v8, %v223_v7 }
  0x26   : > { %v226_v11 = vadd.f32 %v225_v10, %v217_v9 }
  0x28   : > { %228 = vst.msk [vmem:[#allocation3] sm:$0x1] %vm195_vm0, %v226_v11 }
  0x2f   : > { %v232_v12 = vld [vmem:[#allocation3] sm:$0x1] }
  0x30   : > { %v233_v13 = vmax.f32 %v232_v12, 1e-09 }
  0x32   : > { %237 = vperm.xlu0 %417, %v233_v13  }
  0x8b   : > { %v203_v15 = vpop.permute.xlu0 %202 }
  0x8c   : > { %v205_v16 = vmul.f32 %v203_v15, %v197_v14 }
  0x8e   : > { %v207_v17 = vsel %vm206_vm3, %v205_v16, 0.0 }
  0x8f   : > { %v208_v18 = vrot.slane %v207_v17, 4 }
  0x91   : > { %v209_v19 = vadd.f32 %v208_v18, %v207_v17 }
  0x93   : > { %v210_v20 = vrot.slane %v209_v19, 2 }
  0x95   : > { %v211_v21 = vadd.f32 %v210_v20, %v209_v19 }
  0x97   : > { %v212_v22 = vrot.slane %v211_v21, 1 }
  0x99   : > { %v213_v24 = vadd.f32 %v212_v22, %v211_v21 }
  0x9b   : > { %v214_v25 = vadd.f32 %v213_v24, %v199_v23 }
  0x9d   : > { %216 = vst.msk [vmem:[#allocation2] sm:$0x1] %vm193_vm2, %v214_v25 }
  0xa4   : > { %v238_v26 = vpop.permute.xlu0 %237  ;;  %v234_v37 = vld [vmem:[#allocation2] sm:$0x1] }
  0xa5   : > { %v240_v27 = vperm.slane %v238_v26, 0 }
  0xa7   : > { %418 = vrcp.f32 %v240_v27  ;;  %v252_v31 = vand.u32 2147483648, %v240_v27  ;;  %v250_v33 = vand.u32 2147483647, %v240_v27  ;;  %vm246_vm5 = vweird.f32 %v240_v27 }
  0xa9   : > { %v253_v35 = vor.u32 1.1754944e-38, %v252_v31  ;;  %vm251_vm7 = vcmp.eq.f32.partialorder %v250_v33, 8.507059e+37 }
  0xad   : > { %v419_v28 = vpop.eup %418 }
  0xae   : > { %v242_v29 = vmul.f32 %v419_v28, %v240_v27  ;;  %vm247_vm4 = vweird.f32 %v419_v28 }
  0xaf   : > { %vm248_vm6 = vmor %vm246_vm5, %vm247_vm4 }
  0xb0   : > { %v243_v30 = vsub.f32 1.0, %v242_v29 }
  0xb2   : > { %v244_v32 = vmul.f32 %v419_v28, %v243_v30 }
  0xb4   : > { %v245_v34 = vadd.f32 %v419_v28, %v244_v32 }
  0xb6   : > { %v249_v36 = vsel %vm248_vm6, %v419_v28, %v245_v34 }
  0xb7   : > { %v254_v38 = vsel %vm251_vm7, %v253_v35, %v249_v36 }
  0xb8   : > { %v255_v39 = vmul.f32 %v254_v38, %v234_v37 }
  0xba   : > { %256 = vst.msk [vmem:[%s174_s7] sm:$0x1] %vm193_vm2, %v255_v39 }
  0xbb   : > { %447 = shalt.err (!%p444_p5)
}
  0xbc   : > { %360 = dma.vmem_to_hbm [thread:$0]  (%p557_p4), %s269_s8, 16, %s271_s15, %s258_s16  }
  0xbd PF: > { %p366_p6 = scmp.ge.s32.totalorder %s498_s14, 2  ;;  %s282_s27 = sand.u32 1, %s478_s9  }
  0xbe   : > { %s283_s28 = scalar_lea.sflag [#allocation5], %s282_s27 }
  0xbf   : > { %p363_p7 = pnand %p366_p6, %p564_p8 }
  0xc1   : > { %p364_p9 = pneg %p363_p7 }
  0xc3   : > { %473 = dma.done.wait (%p364_p9), %s283_s28, 16  }
  0xc4   : > { %475 = vsyncadd (%p364_p9), %s283_s28, 4294967280  ;;  %s15_s14 = sadd.s32 1, %s498_s14   ;;  %s627_s9 = smov %s482_s10 }
  0xc5   : > { %p12_p10 = scmp.ge.s32.totalorder %s15_s14, 4   ;;  %s628_s10 = smov %s486_s11 }
  0xc6   : > { %s629_s11 = smov %s570_s22  ;;  %s630_s12 = smov %s494_s13 }
  0xc7   : > { %s631_s13 = smov %s633_s17  ;;  %14 = sbr.rel (!%p12_p10) target bundleno = 4 (0x4), region = 74 }
  0xcc   :  { %288 = vsyncpa [#allocation5], 1 }
  0xcd   :  { %290 = vsyncpa [#allocation5 + $0x1], 1 }

</bundles_post_ra>
